<compile_context>
chip_gen: v5e
topology: v5e:2x2
jax: 0.10.0
libtpu: 0.0.40
codegen_flags: <defaults>
</compile_context>

<pallas_src>
import functools

import jax
import jax.numpy as jnp
from jax.experimental import pallas as pl
from jax.experimental.pallas import tpu as pltpu

HIDDEN_DIM = 30
BLOCK_LAYER_NUMS = 3
NUM_LAYERS = BLOCK_LAYER_NUMS - 1  # 2 linear + layernorm + relu stages
LN_EPS = 1e-5


def _round_up(n, m):
    return ((n + m - 1) // m) * m


def resnet_block_kernel(x_ref, wt_ref, b_ref, gamma_ref, beta_ref, o_ref,
                        xp_ref, *, num_layers, true_h):
    """One batch tile of the ResNetBlock forward.

    x_ref:     (TB, H)        input tile at its TRUE feature width (H=30)
    wt_ref:    (L, HP, HP)    transposed linear weights (W_i.T), zero-padded
    b_ref:     (L, 1, HP)     linear biases, zero-padded
    gamma_ref: (L, 1, HP)     layernorm scale, zero-padded
    beta_ref:  (L, 1, HP)     layernorm shift, zero-padded
    o_ref:     (TB, H)        output tile (true width)
    xp_ref:    (TB, HP)       VMEM scratch: lane-dense 128-wide working tile
    """
    h = true_h
    tb, hp = xp_ref.shape
    inv_h = jnp.float32(1.0 / h)
    lane = jax.lax.broadcasted_iota(jnp.int32, (1, hp), 1)
    valid = lane < h  # (1, HP) lane mask for the real feature width

    # Build the lane-dense working tile in VMEM: zero it (so padded lanes are
    # exactly 0, never stale VMEM garbage/NaN), then write the true-width
    # activations into lanes [0, H).  HBM only ever sees the 30-wide tiles.
    xt = x_ref[...]                      # (TB, H), read once
    xp_ref[...] = jnp.zeros_like(xp_ref)
    xp_ref[:, :h] = xt
    out = xp_ref[...]                    # (TB, HP); lanes >= H are zero

    for i in range(num_layers):          # static unroll (num_layers = 2)
        # Linear: out @ W_i.T + b_i (MXU).  Padded output lanes stay 0 because
        # the padded Wt columns and padded bias lanes are zero.
        out = jnp.dot(out, wt_ref[i],
                      preferred_element_type=jnp.float32) + b_ref[i]
        # LayerNorm over the true H lanes.  Padded lanes of `out` are zero, so
        # the lane-sum for the mean is already exact; the mask keeps them out
        # of the variance (exact two-pass form) and re-zeros them for the next
        # matmul.
        mean = jnp.sum(out, axis=-1, keepdims=True) * inv_h
        centered = jnp.where(valid, out - mean, 0.0)
        var = jnp.sum(centered * centered, axis=-1, keepdims=True) * inv_h
        out = centered * jax.lax.rsqrt(var + LN_EPS)      # rsqrt -> EUP
        out = out * gamma_ref[i] + beta_ref[i]            # padded lanes stay 0
        out = jnp.maximum(out, 0.0)                       # ReLU

    # Residual, stored at the true feature width.
    o_ref[...] = (xt + out[:, :h]).astype(o_ref.dtype)


def resnet_block_forward(x, wt_p, b_p, gamma_p, beta_p, *, tb_rows=4096):
    """x: (B, H) f32 at true width; wt_p/b_p/gamma_p/beta_p pre-padded to HP lanes."""
    B, H = x.shape
    L, HP, _ = wt_p.shape

    # Batch tile: as large as practical (amortizes per-step overhead), multiple
    # of 8, but capped so the grid keeps >= 2 steps when the batch allows it
    # (both v7x TensorCores get work via dimension_semantics=("parallel",)).
    half = -(-B // 2)
    tb = max(8, min(tb_rows, _round_up(half, 8)))
    B_pad = _round_up(B, tb)
    x_p = jnp.pad(x, ((0, B_pad - B), (0, 0))) if B_pad != B else x

    kernel = functools.partial(resnet_block_kernel, num_layers=L, true_h=H)
    flops = 2 * L * B_pad * HP * HP
    bytes_accessed = (2 * B_pad * H + L * HP * HP + 3 * L * HP) * 4

    out_p = pl.pallas_call(
        kernel,
        out_shape=jax.ShapeDtypeStruct((B_pad, H), x.dtype),
        grid_spec=pltpu.PrefetchScalarGridSpec(
            num_scalar_prefetch=0,
            grid=(B_pad // tb,),
            in_specs=[
                # Activations at true width (last dim == full array dim).
                pl.BlockSpec((tb, H), lambda i: (i, 0)),
                # Parameters: full blocks, VMEM-resident across grid steps.
                pl.BlockSpec((L, HP, HP), lambda i: (0, 0, 0)),
                pl.BlockSpec((L, 1, HP), lambda i: (0, 0, 0)),
                pl.BlockSpec((L, 1, HP), lambda i: (0, 0, 0)),
                pl.BlockSpec((L, 1, HP), lambda i: (0, 0, 0)),
            ],
            out_specs=pl.BlockSpec((tb, H), lambda i: (i, 0)),
            scratch_shapes=[pltpu.VMEM((tb, HP), jnp.float32)],
        ),
        compiler_params=pltpu.CompilerParams(
            dimension_semantics=("parallel",)),  # shards batch tiles on v7x
        cost_estimate=pl.CostEstimate(flops=flops,
                                      transcendentals=L * B_pad,
                                      bytes_accessed=bytes_accessed),
    )(x_p, wt_p, b_p, gamma_p, beta_p)
    return out_p[:B] if B_pad != B else out_p


def init_params(key, hidden_dim, num_layers):
    """Deterministic synthetic parameters matching nn.Linear / nn.LayerNorm shapes."""
    keys = jax.random.split(key, 2 * num_layers)
    ws, bs = [], []
    bound = 1.0 / jnp.sqrt(hidden_dim)  # PyTorch Linear default init range
    for i in range(num_layers):
        w = jax.random.uniform(keys[2 * i], (hidden_dim, hidden_dim),
                               minval=-bound, maxval=bound, dtype=jnp.float32)
        bias = jax.random.uniform(keys[2 * i + 1], (hidden_dim,),
                                  minval=-bound, maxval=bound, dtype=jnp.float32)
        ws.append(w)
        bs.append(bias)
    W = jnp.stack(ws)                      # (L, H_out, H_in) -- PyTorch layout
    Wt = jnp.transpose(W, (0, 2, 1))       # (L, H_in, H_out) for x @ Wt
    b = jnp.stack(bs).reshape(num_layers, 1, hidden_dim)
    gamma = jnp.ones((num_layers, 1, hidden_dim), jnp.float32)   # LayerNorm weight
    beta = jnp.zeros((num_layers, 1, hidden_dim), jnp.float32)   # LayerNorm bias
    return Wt, b, gamma, beta


def pad_params(Wt, b, gamma, beta):
    """Zero-pad parameters to the lane-dense width ONCE (not per forward call)."""
    L, H, _ = Wt.shape
    HP = _round_up(max(H, 128), 128)
    wt_p = jnp.pad(Wt, ((0, 0), (0, HP - H), (0, HP - H)))
    b_p = jnp.pad(b, ((0, 0), (0, 0), (0, HP - H)))
    gamma_p = jnp.pad(gamma, ((0, 0), (0, 0), (0, HP - H)))
    beta_p = jnp.pad(beta, ((0, 0), (0, 0), (0, HP - H)))
    return wt_p, b_p, gamma_p, beta_p


def reference_forward(x, wt, b, gamma, beta):
    """Pure-JAX reference of the PyTorch forward (for sanity checking)."""
    out = x
    L = wt.shape[0]
    for i in range(L):
        out = out @ wt[i] + b[i]
        mean = jnp.mean(out, axis=-1, keepdims=True)
        var = jnp.mean((out - mean) ** 2, axis=-1, keepdims=True)
        out = (out - mean) / jnp.sqrt(var + LN_EPS) * gamma[i] + beta[i]
        out = jnp.maximum(out, 0.0)
    return x + out


if __name__ == "__main__":
    key = jax.random.PRNGKey(0)
    k_x, k_p = jax.random.split(key)

    batch = 8
    x = jax.random.normal(k_x, (batch, HIDDEN_DIM), dtype=jnp.float32)
    Wt, b, gamma, beta = init_params(k_p, HIDDEN_DIM, NUM_LAYERS)
    # Pad parameters to the 128-lane width once, outside the forward.
    wt_p, b_p, gamma_p, beta_p = pad_params(Wt, b, gamma, beta)

    out = resnet_block_forward(x, wt_p, b_p, gamma_p, beta_p)
    out = jax.block_until_ready(out)

    ref = reference_forward(x, Wt, b, gamma, beta)
    assert out.shape == (batch, HIDDEN_DIM)
    assert jnp.allclose(out, ref, atol=2e-5, rtol=1e-5), "mismatch vs reference"

    print("KERNEL_OK")
</pallas_src>

<mosaic_0001>
module attributes {stable_mosaic.version = 11 : i64} {
  func.func @resnet_block_kernel(%arg0: i32, %arg1: memref<8x30xf32, #tpu.memory_space<vmem>>, %arg2: memref<2x128x128xf32, #tpu.memory_space<vmem>>, %arg3: memref<2x1x128xf32, #tpu.memory_space<vmem>>, %arg4: memref<2x1x128xf32, #tpu.memory_space<vmem>>, %arg5: memref<2x1x128xf32, #tpu.memory_space<vmem>>, %arg6: memref<8x30xf32, #tpu.memory_space<vmem>>, %arg7: memref<8x128xf32, #tpu.memory_space<vmem>>) attributes {dimension_semantics = [#tpu.dimension_semantics<parallel>], iteration_bounds = array<i64: 1>, scalar_prefetch = 0 : i64, scratch_operands = 1 : i64, tpu.core_type = #tpu.core_type<tc>, window_params = [{transform_indices = @transform_0, window_bounds = array<i64: 8, 30>}, {pipeline_mode = #tpu.pipeline_mode<synchronous>, transform_indices = @transform_1, window_bounds = array<i64: 2, 128, 128>}, {pipeline_mode = #tpu.pipeline_mode<synchronous>, transform_indices = @transform_2, window_bounds = array<i64: 2, 1, 128>}, {pipeline_mode = #tpu.pipeline_mode<synchronous>, transform_indices = @transform_3, window_bounds = array<i64: 2, 1, 128>}, {pipeline_mode = #tpu.pipeline_mode<synchronous>, transform_indices = @transform_4, window_bounds = array<i64: 2, 1, 128>}, {transform_indices = @transform_5, window_bounds = array<i64: 8, 30>}]} {
    %0 = tpu.iota {dimensions = array<i32: 1>} : vector<1x128xi32>
    %c30_i32 = arith.constant 30 : i32
    %1 = vector.broadcast %c30_i32 : i32 to vector<1x128xi32>
    %2 = arith.cmpi slt, %0, %1 : vector<1x128xi32>
    %c0 = arith.constant 0 : index
    %c0_0 = arith.constant 0 : index
    %3 = vector.load %arg1[%c0, %c0_0] : memref<8x30xf32, #tpu.memory_space<vmem>>, vector<8x30xf32>
    %cst = arith.constant 0.000000e+00 : f32
    %4 = vector.broadcast %cst : f32 to vector<8x128xf32>
    %c0_1 = arith.constant 0 : index
    %c0_2 = arith.constant 0 : index
    %5 = vector.load %arg7[%c0_1, %c0_2] : memref<8x128xf32, #tpu.memory_space<vmem>>, vector<8x128xf32>
    tpu.vector_store %arg7[%c0_1, %c0_2], %4 {strides = array<i32>} : memref<8x128xf32, #tpu.memory_space<vmem>>, vector<8x128xf32>,
    %c0_3 = arith.constant 0 : index
    %c0_4 = arith.constant 0 : index
    %6 = vector.load %arg7[%c0_3, %c0_4] : memref<8x128xf32, #tpu.memory_space<vmem>>, vector<8x30xf32>
    tpu.vector_store %arg7[%c0_3, %c0_4], %3 {strides = array<i32>} : memref<8x128xf32, #tpu.memory_space<vmem>>, vector<8x30xf32>,
    %c0_5 = arith.constant 0 : index
    %c0_6 = arith.constant 0 : index
    %7 = vector.load %arg7[%c0_5, %c0_6] : memref<8x128xf32, #tpu.memory_space<vmem>>, vector<8x128xf32>
    %c0_7 = arith.constant 0 : index
    %c0_8 = arith.constant 0 : index
    %c0_9 = arith.constant 0 : index
    %8 = vector.load %arg2[%c0_7, %c0_8, %c0_9] : memref<2x128x128xf32, #tpu.memory_space<vmem>>, vector<1x128x128xf32>
    %9 = vector.shape_cast %8 : vector<1x128x128xf32> to vector<128x128xf32>
    %cst_10 = arith.constant dense<0.000000e+00> : vector<8x128xf32>
    %10 = tpu.matmul %7, %9, %cst_10 {dimension_numbers = #tpu.dot_dimension_numbers<[1], [0], [0], [1], [0, 0, 1, 1], [], []>} : vector<8x128xf32>, vector<128x128xf32>, vector<8x128xf32> -> vector<8x128xf32>
    %c0_11 = arith.constant 0 : index
    %c0_12 = arith.constant 0 : index
    %c0_13 = arith.constant 0 : index
    %11 = vector.load %arg3[%c0_11, %c0_12, %c0_13] : memref<2x1x128xf32, #tpu.memory_space<vmem>>, vector<1x1x128xf32>
    %12 = vector.shape_cast %11 : vector<1x1x128xf32> to vector<1x128xf32>
    %13 = vector.broadcast %12 : vector<1x128xf32> to vector<8x128xf32>
    %14 = arith.addf %10, %13 : vector<8x128xf32>
    %cst_14 = arith.constant dense<0.000000e+00> : vector<8xf32>
    %15 = vector.multi_reduction <add>, %14, %cst_14 [1] : vector<8x128xf32> to vector<8xf32>
    %16 = vector.shape_cast %15 : vector<8xf32> to vector<8x1xf32>
    %cst_15 = arith.constant 0.0333333351 : f32
    %17 = vector.broadcast %cst_15 : f32 to vector<8x1xf32>
    %18 = arith.mulf %16, %17 : vector<8x1xf32>
    %19 = vector.broadcast %18 : vector<8x1xf32> to vector<8x128xf32>
    %20 = arith.subf %14, %19 : vector<8x128xf32>
    %cst_16 = arith.constant 0.000000e+00 : f32
    %21 = vector.shape_cast %2 : vector<1x128xi1> to vector<1x128xi1>
    %22 = vector.broadcast %21 : vector<1x128xi1> to vector<8x128xi1>
    %23 = vector.broadcast %cst_16 : f32 to vector<8x128xf32>
    %24 = arith.select %22, %20, %23 : vector<8x128xi1>, vector<8x128xf32>
    %25 = arith.mulf %24, %24 : vector<8x128xf32>
    %cst_17 = arith.constant dense<0.000000e+00> : vector<8xf32>
    %26 = vector.multi_reduction <add>, %25, %cst_17 [1] : vector<8x128xf32> to vector<8xf32>
    %27 = vector.shape_cast %26 : vector<8xf32> to vector<8x1xf32>
    %cst_18 = arith.constant 0.0333333351 : f32
    %28 = vector.broadcast %cst_18 : f32 to vector<8x1xf32>
    %29 = arith.mulf %27, %28 : vector<8x1xf32>
    %cst_19 = arith.constant 9.99999974E-6 : f32
    %30 = vector.broadcast %cst_19 : f32 to vector<8x1xf32>
    %31 = arith.addf %29, %30 : vector<8x1xf32>
    %32 = math.rsqrt %31 : vector<8x1xf32>
    %33 = vector.broadcast %32 : vector<8x1xf32> to vector<8x128xf32>
    %34 = arith.mulf %24, %33 : vector<8x128xf32>
    %c0_20 = arith.constant 0 : index
    %c0_21 = arith.constant 0 : index
    %c0_22 = arith.constant 0 : index
    %35 = vector.load %arg4[%c0_20, %c0_21, %c0_22] : memref<2x1x128xf32, #tpu.memory_space<vmem>>, vector<1x1x128xf32>
    %36 = vector.shape_cast %35 : vector<1x1x128xf32> to vector<1x128xf32>
    %37 = vector.broadcast %36 : vector<1x128xf32> to vector<8x128xf32>
    %38 = arith.mulf %34, %37 : vector<8x128xf32>
    %c0_23 = arith.constant 0 : index
    %c0_24 = arith.constant 0 : index
    %c0_25 = arith.constant 0 : index
    %39 = vector.load %arg5[%c0_23, %c0_24, %c0_25] : memref<2x1x128xf32, #tpu.memory_space<vmem>>, vector<1x1x128xf32>
    %40 = vector.shape_cast %39 : vector<1x1x128xf32> to vector<1x128xf32>
    %41 = vector.broadcast %40 : vector<1x128xf32> to vector<8x128xf32>
    %42 = arith.addf %38, %41 : vector<8x128xf32>
    %cst_26 = arith.constant 0.000000e+00 : f32
    %43 = vector.broadcast %cst_26 : f32 to vector<8x128xf32>
    %44 = arith.maximumf %42, %43 : vector<8x128xf32>
    %c1 = arith.constant 1 : index
    %c0_27 = arith.constant 0 : index
    %c0_28 = arith.constant 0 : index
    %45 = vector.load %arg2[%c1, %c0_27, %c0_28] : memref<2x128x128xf32, #tpu.memory_space<vmem>>, vector<1x128x128xf32>
    %46 = vector.shape_cast %45 : vector<1x128x128xf32> to vector<128x128xf32>
    %cst_29 = arith.constant dense<0.000000e+00> : vector<8x128xf32>
    %47 = tpu.matmul %44, %46, %cst_29 {dimension_numbers = #tpu.dot_dimension_numbers<[1], [0], [0], [1], [0, 0, 1, 1], [], []>} : vector<8x128xf32>, vector<128x128xf32>, vector<8x128xf32> -> vector<8x128xf32>
    %c1_30 = arith.constant 1 : index
    %c0_31 = arith.constant 0 : index
    %c0_32 = arith.constant 0 : index
    %48 = vector.load %arg3[%c1_30, %c0_31, %c0_32] : memref<2x1x128xf32, #tpu.memory_space<vmem>>, vector<1x1x128xf32>
    %49 = vector.shape_cast %48 : vector<1x1x128xf32> to vector<1x128xf32>
    %50 = vector.broadcast %49 : vector<1x128xf32> to vector<8x128xf32>
    %51 = arith.addf %47, %50 : vector<8x128xf32>
    %cst_33 = arith.constant dense<0.000000e+00> : vector<8xf32>
    %52 = vector.multi_reduction <add>, %51, %cst_33 [1] : vector<8x128xf32> to vector<8xf32>
    %53 = vector.shape_cast %52 : vector<8xf32> to vector<8x1xf32>
    %cst_34 = arith.constant 0.0333333351 : f32
    %54 = vector.broadcast %cst_34 : f32 to vector<8x1xf32>
    %55 = arith.mulf %53, %54 : vector<8x1xf32>
    %56 = vector.broadcast %55 : vector<8x1xf32> to vector<8x128xf32>
    %57 = arith.subf %51, %56 : vector<8x128xf32>
    %cst_35 = arith.constant 0.000000e+00 : f32
    %58 = vector.shape_cast %2 : vector<1x128xi1> to vector<1x128xi1>
    %59 = vector.broadcast %58 : vector<1x128xi1> to vector<8x128xi1>
    %60 = vector.broadcast %cst_35 : f32 to vector<8x128xf32>
    %61 = arith.select %59, %57, %60 : vector<8x128xi1>, vector<8x128xf32>
    %62 = arith.mulf %61, %61 : vector<8x128xf32>
    %cst_36 = arith.constant dense<0.000000e+00> : vector<8xf32>
    %63 = vector.multi_reduction <add>, %62, %cst_36 [1] : vector<8x128xf32> to vector<8xf32>
    %64 = vector.shape_cast %63 : vector<8xf32> to vector<8x1xf32>
    %cst_37 = arith.constant 0.0333333351 : f32
    %65 = vector.broadcast %cst_37 : f32 to vector<8x1xf32>
    %66 = arith.mulf %64, %65 : vector<8x1xf32>
    %cst_38 = arith.constant 9.99999974E-6 : f32
    %67 = vector.broadcast %cst_38 : f32 to vector<8x1xf32>
    %68 = arith.addf %66, %67 : vector<8x1xf32>
    %69 = math.rsqrt %68 : vector<8x1xf32>
    %70 = vector.broadcast %69 : vector<8x1xf32> to vector<8x128xf32>
    %71 = arith.mulf %61, %70 : vector<8x128xf32>
    %c1_39 = arith.constant 1 : index
    %c0_40 = arith.constant 0 : index
    %c0_41 = arith.constant 0 : index
    %72 = vector.load %arg4[%c1_39, %c0_40, %c0_41] : memref<2x1x128xf32, #tpu.memory_space<vmem>>, vector<1x1x128xf32>
    %73 = vector.shape_cast %72 : vector<1x1x128xf32> to vector<1x128xf32>
    %74 = vector.broadcast %73 : vector<1x128xf32> to vector<8x128xf32>
    %75 = arith.mulf %71, %74 : vector<8x128xf32>
    %c1_42 = arith.constant 1 : index
    %c0_43 = arith.constant 0 : index
    %c0_44 = arith.constant 0 : index
    %76 = vector.load %arg5[%c1_42, %c0_43, %c0_44] : memref<2x1x128xf32, #tpu.memory_space<vmem>>, vector<1x1x128xf32>
    %77 = vector.shape_cast %76 : vector<1x1x128xf32> to vector<1x128xf32>
    %78 = vector.broadcast %77 : vector<1x128xf32> to vector<8x128xf32>
    %79 = arith.addf %75, %78 : vector<8x128xf32>
    %cst_45 = arith.constant 0.000000e+00 : f32
    %80 = vector.broadcast %cst_45 : f32 to vector<8x128xf32>
    %81 = arith.maximumf %79, %80 : vector<8x128xf32>
    %82 = vector.extract_strided_slice %81 {offsets = [0, 0], sizes = [8, 30], strides = [1, 1]} : vector<8x128xf32> to vector<8x30xf32>
    %83 = arith.addf %3, %82 : vector<8x30xf32>
    %c0_46 = arith.constant 0 : index
    %c0_47 = arith.constant 0 : index
    %84 = vector.load %arg6[%c0_46, %c0_47] : memref<8x30xf32, #tpu.memory_space<vmem>>, vector<8x30xf32>
    tpu.vector_store %arg6[%c0_46, %c0_47], %83 {strides = array<i32>} : memref<8x30xf32, #tpu.memory_space<vmem>>, vector<8x30xf32>,
    return
  }
  func.func @transform_0(%arg0: i32) -> (i32, i32) {
    %c0_i32 = arith.constant 0 : i32
    %c0_i32_0 = arith.constant 0 : i32
    return %arg0, %c0_i32 : i32, i32
  }
  func.func @transform_1(%arg0: i32) -> (i32, i32, i32) {
    %c0_i32 = arith.constant 0 : i32
    %c0_i32_0 = arith.constant 0 : i32
    %c0_i32_1 = arith.constant 0 : i32
    %c0_i32_2 = arith.constant 0 : i32
    return %c0_i32, %c0_i32_0, %c0_i32_1 : i32, i32, i32
  }
  func.func @transform_2(%arg0: i32) -> (i32, i32, i32) {
    %c0_i32 = arith.constant 0 : i32
    %c0_i32_0 = arith.constant 0 : i32
    %c0_i32_1 = arith.constant 0 : i32
    %c0_i32_2 = arith.constant 0 : i32
    return %c0_i32, %c0_i32_0, %c0_i32_1 : i32, i32, i32
  }
  func.func @transform_3(%arg0: i32) -> (i32, i32, i32) {
    %c0_i32 = arith.constant 0 : i32
    %c0_i32_0 = arith.constant 0 : i32
    %c0_i32_1 = arith.constant 0 : i32
    %c0_i32_2 = arith.constant 0 : i32
    return %c0_i32, %c0_i32_0, %c0_i32_1 : i32, i32, i32
  }
  func.func @transform_4(%arg0: i32) -> (i32, i32, i32) {
    %c0_i32 = arith.constant 0 : i32
    %c0_i32_0 = arith.constant 0 : i32
    %c0_i32_1 = arith.constant 0 : i32
    %c0_i32_2 = arith.constant 0 : i32
    return %c0_i32, %c0_i32_0, %c0_i32_1 : i32, i32, i32
  }
  func.func @transform_5(%arg0: i32) -> (i32, i32) {
    %c0_i32 = arith.constant 0 : i32
    %c0_i32_0 = arith.constant 0 : i32
    return %arg0, %c0_i32 : i32, i32
  }
}

</mosaic_0001>

<bundles_post_ra>
// kernel: tpu_custom_call.1
= control target key start
LH: loop header
LB: loop body
LE: loop exit
PB: predicated region body
PF: predicated region fallthrough
CT: control target
= control target key end

     0   :  { %10 = vsyncpa [#allocation4], 0  ;;  %s484_s0 = inlined_call_operand.hbm [shape: f32[8,30], index: 0, kind: input, shape index: {}]   ;;  %s485_s1 = inlined_call_operand.hbm [shape: f32[2,128,128], index: 1, kind: input, shape index: {}]   ;;  %s486_s2 = inlined_call_operand.hbm [shape: f32[2,1,128], index: 2, kind: input, shape index: {}]   ;;  %s487_s3 = inlined_call_operand.vmem [shape: f32[2,1,128], index: 3, kind: input, shape index: {}]   ;;  %s488_s4 = inlined_call_operand.hbm [shape: f32[2,1,128], index: 4, kind: input, shape index: {}]   ;;  %s489_s5 = inlined_call_operand.hbm [shape: f32[8,30], index: 5, kind: output, shape index: {}]  }
   0x1   :  { %11 = vsyncpa [#allocation7], 0 }
   0x2   :  { %12 = vsyncpa [#allocation10], 0  ;;  %s29_s20 = sshll.u32 %s485_s1, 4  ;;  %s30_s20 = int_to_ptr.hbm [resolvable:$true] %s29_s20 }
   0x3   :  { %13 = vsyncpa [#allocation5], 0  ;;  %s410_s21 = smov [#allocation6]   ;;  %s19_s25 = sshll.u32 %s484_s0, 4  ;;  %s20_s25 = int_to_ptr.hbm [resolvable:$true] %s19_s25 }
   0x4   :  { %s31_s22 = sshll.u32 %s410_s21, 4  ;;  %s411_s26 = smov 128   ;;  %s32_s22 = int_to_ptr.vmem [resolvable:$true] %s31_s22 }
   0x5   :  { %s412_s27 = smov 8   ;;  %s413_s28 = smov [#allocation3]  }
   0x6   :  { %37 = dma.hbm_to_vmem [thread:$0]  %s30_s20, 4096, %s32_s22, [#allocation7], %s411_s26, %s411_s26, %s412_s27  }
   0x7   :  { %s21_s29 = sshll.u32 %s413_s28, 4  ;;  %s42_s7 = sshll.u32 %s486_s2, 4  ;;  %s22_s29 = int_to_ptr.vmem [resolvable:$true] %s21_s29  ;;  %s43_s7 = int_to_ptr.hbm [resolvable:$true] %s42_s7 }
   0x8   :  { %24 = dma.hbm_to_vmem [thread:$0]  %s20_s25, 128, %s22_s29, [#allocation4]  }
   0x9   :  { %s414_s1 = smov [#allocation8]   ;;  %s57_s0 = sshll.u32 %s488_s4, 4  ;;  %s58_s0 = int_to_ptr.hbm [resolvable:$true] %s57_s0 }
   0xa   :  { %s44_s8 = sshll.u32 %s414_s1, 4  ;;  %s415_s11 = smov 16   ;;  %s45_s8 = int_to_ptr.vmem [resolvable:$true] %s44_s8 }
   0xb   :  { %s416_s12 = smov 1   ;;  %s417_s13 = smov [#allocation9]  }
   0xc   :  { %50 = dma.hbm_to_vmem [thread:$0]  %s43_s7, 32, %s45_s8, [#allocation7], %s415_s11, %s415_s11, %s416_s12  }
   0xd   :  { %s59_s14 = sshll.u32 %s417_s13, 4  ;;  %s60_s14 = int_to_ptr.vmem [resolvable:$true] %s59_s14 }
   0xe   :  { %65 = dma.hbm_to_vmem [thread:$0]  %s58_s0, 32, %s60_s14, [#allocation10], %s415_s11, %s415_s11, %s416_s12  }
   0xf   :  { %402 = dma.done.wait [#allocation4], 128  }
  0x10   :  { %403 = vsyncadd [#allocation4], 4294967168 }
  0x11   :  { %404 = dma.done.wait [#allocation7], 4128  }
  0x12   :  { %405 = vsyncadd [#allocation7], 4294963168 }
  0x13   :  { %406 = dma.done.wait [#allocation10], 32  }
  0x14   :  { %407 = vsyncadd [#allocation10], 4294967264  ;;  %v418_v0 = vmov 0.0   ;;  %v105_v1 = vld [vmem:[#allocation6 + $0x78] sm:$0xff]  ;;  %v104_v2 = vld [vmem:[#allocation6 + $0x70] sm:$0xff]  ;;  %vm87_vm0 = vcmask 244736   ;;  %v82_v23 = vlaneseq }
  0x15   :  { %86 = vst [vmem:[#allocation2] sm:$0xff] %v418_v0  ;;  %110 = vmatpush.msra.mxu0 %v105_v1  ;;  %v103_v3 = vld [vmem:[#allocation6 + $0x68] sm:$0xff]  ;;  %v102_v4 = vld [vmem:[#allocation6 + $0x60] sm:$0xff]  ;;  %v462_v5 = vld [vmem:[#allocation3] sm:$0xff]  ;;  %s419_s17 = smov [#allocation11]   ;;  %s249_s21 = sshll.u32 %s489_s5, 4  ;;  %s250_s21 = int_to_ptr.hbm [resolvable:$true] %s249_s21 }
  0x16   :  { %v101_v6 = vld [vmem:[#allocation6 + $0x58] sm:$0xff]  ;;  %88 = vst.msk [vmem:[#allocation2] sm:$0xff] %vm87_vm0, %v462_v5  ;;  %v100_v7 = vld [vmem:[#allocation6 + $0x50] sm:$0xff]  ;;  %v99_v8 = vld [vmem:[#allocation6 + $0x48] sm:$0xff]  ;;  %v466_v24 = vand.u32 127, %v82_v23  ;;  %s247_s18 = sshll.u32 %s419_s17, 4  ;;  %s248_s18 = int_to_ptr.vmem [resolvable:$true] %s247_s18 }
  0x17   :  { %111 = vmatpush.msra.mxu0 %v104_v2  ;;  %v98_v9 = vld [vmem:[#allocation6 + $0x40] sm:$0xff]  ;;  %v97_v10 = vld [vmem:[#allocation6 + $0x38] sm:$0xff]  ;;  %v96_v11 = vld [vmem:[#allocation6 + $0x30] sm:$0xff] }
  0x18   :  { %v95_v12 = vld [vmem:[#allocation6 + $0x28] sm:$0xff]  ;;  %v94_v13 = vld [vmem:[#allocation6 + $0x20] sm:$0xff]  ;;  %v93_v14 = vld [vmem:[#allocation6 + $0x18] sm:$0xff]  ;;  %vm84_vm1 = vcmp.lt.s32.totalorder %v466_v24, 30 }
  0x19   :  { %112 = vmatpush.msra.mxu0 %v103_v3  ;;  %v92_v15 = vld [vmem:[#allocation6 + $0x10] sm:$0xff]  ;;  %v91_v16 = vld [vmem:[#allocation6 + $0x8] sm:$0xff]  ;;  %v90_v17 = vld [vmem:[#allocation6] sm:$0xff] }
  0x1a   :  { %v272_v19 = vld [vmem:[#allocation8] ss:$0 sm:$0xff]  ;;  %v180_v22 = vld [vmem:[#allocation6 + $0xf8] sm:$0xff]  ;;  %v179_v30 = vld [vmem:[#allocation6 + $0xf0] sm:$0xff] }
  0x1b   :  { %113 = vmatpush.msra.mxu0 %v102_v4  ;;  %186 = vmatpush.msra.mxu1 %v180_v22  ;;  %v178_v31 = vld [vmem:[#allocation6 + $0xe8] sm:$0xff]  ;;  %v177_v32 = vld [vmem:[#allocation6 + $0xe0] sm:$0xff]  ;;  %v176_v33 = vld [vmem:[#allocation6 + $0xd8] sm:$0xff] }
  0x1c   :  { %v175_v34 = vld [vmem:[#allocation6 + $0xd0] sm:$0xff]  ;;  %v174_v35 = vld [vmem:[#allocation6 + $0xc8] sm:$0xff]  ;;  %v173_v36 = vld [vmem:[#allocation6 + $0xc0] sm:$0xff] }
  0x1d   :  { %114 = vmatpush.msra.mxu0 %v101_v6  ;;  %v89_v18 = vld [vmem:[#allocation2] sm:$0xff]  ;;  %187 = vmatpush.msra.mxu1 %v179_v30  ;;  %v172_v37 = vld [vmem:[#allocation6 + $0xb8] sm:$0xff]  ;;  %v170_v39 = vld [vmem:[#allocation6 + $0xa8] sm:$0xff] }
  0x1e   :  { %v171_v38 = vld [vmem:[#allocation6 + $0xb0] sm:$0xff]  ;;  %v169_v40 = vld [vmem:[#allocation6 + $0xa0] sm:$0xff]  ;;  %v168_v41 = vld [vmem:[#allocation6 + $0x98] sm:$0xff] }
  0x1f   :  { %115 = vmatpush.msra.mxu0 %v100_v7  ;;  %188 = vmatpush.msra.mxu1 %v178_v31  ;;  %v167_v42 = vld [vmem:[#allocation6 + $0x90] sm:$0xff]  ;;  %v166_v43 = vld [vmem:[#allocation6 + $0x88] sm:$0xff]  ;;  %v165_v44 = vld [vmem:[#allocation6 + $0x80] sm:$0xff] }
  0x20   :  { %v273_v54 = vld [vmem:[%s487_s3] ss:$0 sm:$0xff]  ;;  %v274_v57 = vld [vmem:[#allocation9] ss:$0 sm:$0xff]  ;;  %v275_v61 = vld [vmem:[#allocation8 + $0x1] ss:$0 sm:$0xff] }
  0x21   :  { %116 = vmatpush.msra.mxu0 %v99_v8  ;;  %189 = vmatpush.msra.mxu1 %v177_v32 }
  0x23   :  { %117 = vmatpush.msra.mxu0 %v98_v9  ;;  %190 = vmatpush.msra.mxu1 %v176_v33 }
  0x25   :  { %118 = vmatpush.msra.mxu0 %v97_v10  ;;  %191 = vmatpush.msra.mxu1 %v175_v34 }
  0x27   :  { %119 = vmatpush.msra.mxu0 %v96_v11  ;;  %192 = vmatpush.msra.mxu1 %v174_v35 }
  0x29   :  { %120 = vmatpush.msra.mxu0 %v95_v12  ;;  %193 = vmatpush.msra.mxu1 %v173_v36 }
  0x2b   :  { %121 = vmatpush.msra.mxu0 %v94_v13  ;;  %194 = vmatpush.msra.mxu1 %v172_v37 }
  0x2d   :  { %122 = vmatpush.msra.mxu0 %v93_v14  ;;  %195 = vmatpush.msra.mxu1 %v171_v38 }
  0x2f   :  { %123 = vmatpush.msra.mxu0 %v92_v15  ;;  %196 = vmatpush.msra.mxu1 %v170_v39  ;;  %v276_v15 = vld [vmem:[%s487_s3 + $0x1] ss:$0 sm:$0xff] }
  0x31   :  { %124 = vmatpush.msra.mxu0 %v91_v16  ;;  %197 = vmatpush.msra.mxu1 %v169_v40 }
  0x33   :  { %125 = vmatpush.msra.mxu0 %v90_v17  ;;  %198 = vmatpush.msra.mxu1 %v168_v41 }
  0x34   :  { %126 = vmatmul.f32.vlgmr.msra.gmra.mxu0 %v89_v18  ;;  %v277_v18 = vld [vmem:[#allocation9 + $0x1] ss:$0 sm:$0xff] }
  0x35   :  { %199 = vmatpush.msra.mxu1 %v167_v42 }
  0x37   :  { %200 = vmatpush.msra.mxu1 %v166_v43 }
  0x39   :  { %201 = vmatpush.msra.mxu1 %v165_v44 }
  0xb1   :  { %v127_v20 = vpop.f32.mrf.mxu0 }
  0xb2   :  { %v128_v21 = vadd.f32 %v272_v19, %v127_v20 }
  0xb4   :  { %130 = vadd.xlane.f32.xlu0 %v128_v21 }
 0x127   :  { %v131_v25 = vpop.xlane.xlu0 %130 }
 0x128   :  { %v132_v26 = vmul.f32 0.033333335, %v131_v25 }
 0x12a   :  { %v133_v27 = vsub.f32 %v128_v21, %v132_v26 }
 0x12c   :  { %v136_v28 = vsel %vm84_vm1, %v133_v27, 0.0 }
 0x12d   :  { %v137_v29 = vmul.f32 %v136_v28, %v136_v28 }
 0x12f   :  { %138 = vadd.xlane.f32.xlu0 %v137_v29 }
 0x1a2   :  { %v139_v45 = vpop.xlane.xlu0 %138 }
 0x1a3   :  { %v140_v46 = vmul.f32 0.033333335, %v139_v45 }
 0x1a5   :  { %v141_v47 = vadd.f32 1e-05, %v140_v46 }
 0x1a7   :  { %278 = vrsqrt.f32 %v141_v47  ;;  %vm148_vm3 = vweird.f32 %v141_v47 }
 0x1ad   :  { %v279_v48 = vpop.eup %278 }
 0x1ae   :  { %v143_v49 = vmul.f32 %v279_v48, %v141_v47  ;;  %vm149_vm2 = vweird.f32 %v279_v48 }
 0x1af   :  { %vm150_vm4 = vmor %vm148_vm3, %vm149_vm2 }
 0x1b0   :  { %v144_v50 = vmul.f32 %v279_v48, %v143_v49 }
 0x1b2   :  { %v145_v51 = vmul.f32 0.5, %v144_v50 }
 0x1b4   :  { %v146_v52 = vsub.f32 1.5, %v145_v51 }
 0x1b6   :  { %v147_v53 = vmul.f32 %v279_v48, %v146_v52 }
 0x1b8   :  { %v151_v55 = vsel %vm150_vm4, %v279_v48, %v147_v53 }
 0x1b9   :  { %v152_v56 = vmul.f32 %v151_v55, %v136_v28 }
 0x1bb   :  { %v157_v58 = vmul.f32 %v273_v54, %v152_v56 }
 0x1bd   :  { %v162_v59 = vadd.f32 %v274_v57, %v157_v58 }
 0x1bf   :  { %v163_v60 = vmax.f32 %v162_v59, 0.0 }
 0x1c1   :  { %202 = vmatmul.f32.vlgmr.msra.gmra.mxu1 %v163_v60 }
 0x23e   :  { %v203_v62 = vpop.f32.mrf.mxu1 }
 0x23f   :  { %v204_v63 = vadd.f32 %v275_v61, %v203_v62 }
 0x241   :  { %206 = vadd.xlane.f32.xlu1 %v204_v63 }
 0x2b4   :  { %v207_v0 = vpop.xlane.xlu1 %206 }
 0x2b5   :  { %v208_v1 = vmul.f32 0.033333335, %v207_v0 }
 0x2b7   :  { %v209_v2 = vsub.f32 %v204_v63, %v208_v1 }
 0x2b9   :  { %v210_v3 = vsel %vm84_vm1, %v209_v2, 0.0 }
 0x2ba   :  { %v211_v4 = vmul.f32 %v210_v3, %v210_v3 }
 0x2bc   :  { %212 = vadd.xlane.f32.xlu1 %v211_v4 }
 0x32f   :  { %v213_v6 = vpop.xlane.xlu1 %212 }
 0x330   :  { %v214_v7 = vmul.f32 0.033333335, %v213_v6 }
 0x332   :  { %v215_v8 = vadd.f32 1e-05, %v214_v7 }
 0x334   :  { %280 = vrsqrt.f32 %v215_v8  ;;  %vm222_vm6 = vweird.f32 %v215_v8 }
 0x33a   :  { %v281_v9 = vpop.eup %280 }
 0x33b   :  { %v217_v10 = vmul.f32 %v281_v9, %v215_v8  ;;  %vm223_vm5 = vweird.f32 %v281_v9 }
 0x33c   :  { %vm224_vm7 = vmor %vm222_vm6, %vm223_vm5 }
 0x33d   :  { %v218_v11 = vmul.f32 %v281_v9, %v217_v10 }
 0x33f   :  { %v219_v12 = vmul.f32 0.5, %v218_v11 }
 0x341   :  { %v220_v13 = vsub.f32 1.5, %v219_v12 }
 0x343   :  { %v221_v14 = vmul.f32 %v281_v9, %v220_v13 }
 0x345   :  { %v225_v16 = vsel %vm224_vm7, %v281_v9, %v221_v14 }
 0x346   :  { %v226_v17 = vmul.f32 %v225_v16, %v210_v3 }
 0x348   :  { %v232_v19 = vmul.f32 %v276_v15, %v226_v17 }
 0x34a   :  { %v238_v20 = vadd.f32 %v277_v18, %v232_v19 }
 0x34c   :  { %v239_v21 = vmax.f32 %v238_v20, 0.0 }
 0x34e   :  { %v240_v22 = vadd.f32 %v239_v21, %v462_v5 }
 0x350   :  { %241 = vst.msk [vmem:[#allocation11] sm:$0xff] %vm87_vm0, %v240_v22 }
 0x351   :  { %252 = dma.vmem_to_hbm [thread:$0]  %s248_s18, 128, %s250_s21, [#allocation5]  }
 0x352   :  { %408 = dma.done.wait [#allocation5], 128  }
 0x353   :  { %409 = vsyncadd [#allocation5], 4294967168 }
 0x354   :  { %257 = vsyncpa [#allocation4], 1 }
 0x355   :  { %258 = vsyncpa [#allocation7], 1 }
 0x356   :  { %259 = vsyncpa [#allocation10], 1 }
 0x357   :  { %260 = vsyncpa [#allocation5], 1 }

</bundles_post_ra>
